<compile_context>
chip_gen: v7x
topology: tpu7x:2x2x1
jax: 0.10.0
libtpu: 0.0.40
codegen_flags: <defaults>
</compile_context>

<pallas_src>
import math
from functools import partial

import jax
import jax.numpy as jnp
from jax.experimental import pallas as pl
from jax.experimental.pallas import tpu as pltpu


ROW_TILE = 256          # token-axis tile for linear / FFN / LN kernels
VOCAB_COL_TILE = 2048   # lane-dense column tile for the vocab projection
ATTN_Q_TILE = 256
ATTN_KV_TILE = 256
NEG_INF = -1e30


# ----------------------------- Pallas kernels ------------------------------

def _linear_kernel(x_ref, w_ref, b_ref, o_ref):
    # o = x @ w^T + b ; w stays in torch (Nout, K) layout, contracted on K.
    acc = jax.lax.dot_general(
        x_ref[...].astype(jnp.bfloat16), w_ref[...],
        (((1,), (1,)), ((), ())), preferred_element_type=jnp.float32)
    o_ref[...] = (acc + b_ref[...]).astype(o_ref.dtype)


def linear(x, w, b, *, out_dtype=jnp.float32,
           row_tile=ROW_TILE, col_tile=None):
    """x: (N, K) f32/bf16, w: (Nout, K) bf16 (torch layout), b: (Nout,) f32."""
    N, K = x.shape
    Nout = w.shape[0]
    tn = min(N, row_tile)
    tv = Nout if col_tile is None else min(Nout, col_tile)
    grid = (pl.cdiv(N, tn), pl.cdiv(Nout, tv))
    return pl.pallas_call(
        _linear_kernel,
        grid=grid,
        in_specs=[pl.BlockSpec((tn, K), lambda i, j: (i, 0)),
                  pl.BlockSpec((tv, K), lambda i, j: (j, 0)),
                  pl.BlockSpec((1, tv), lambda i, j: (0, j))],
        out_specs=pl.BlockSpec((tn, tv), lambda i, j: (i, j)),
        out_shape=jax.ShapeDtypeStruct((N, Nout), out_dtype),
        compiler_params=pltpu.CompilerParams(
            dimension_semantics=("parallel", "parallel")),
    )(x, w, b.reshape(1, Nout))


def _layernorm(y, g, beta, eps):
    mean = jnp.mean(y, axis=-1, keepdims=True)
    var = jnp.mean(jnp.square(y - mean), axis=-1, keepdims=True)
    return (y - mean) * jax.lax.rsqrt(var + eps) * g + beta


def _proj_add_ln_kernel(a_ref, res_ref, w_ref, b_ref, g_ref, beta_ref,
                        o_ref, *, eps):
    # out = LayerNorm(res + (a @ w^T + b))  -- attention out-proj epilogue.
    proj = jax.lax.dot_general(
        a_ref[...], w_ref[...],
        (((1,), (1,)), ((), ())), preferred_element_type=jnp.float32)
    y = res_ref[...] + proj + b_ref[...]
    o_ref[...] = _layernorm(y, g_ref[...], beta_ref[...], eps).astype(o_ref.dtype)


def proj_add_ln(a, res, w, b, g, beta, *, eps=1e-5, row_tile=ROW_TILE):
    N, D = res.shape
    tn = min(N, row_tile)
    return pl.pallas_call(
        partial(_proj_add_ln_kernel, eps=eps),
        grid=(pl.cdiv(N, tn),),
        in_specs=[pl.BlockSpec((tn, D), lambda i: (i, 0)),
                  pl.BlockSpec((tn, D), lambda i: (i, 0)),
                  pl.BlockSpec((D, D), lambda i: (0, 0)),
                  pl.BlockSpec((1, D), lambda i: (0, 0)),
                  pl.BlockSpec((1, D), lambda i: (0, 0)),
                  pl.BlockSpec((1, D), lambda i: (0, 0))],
        out_specs=pl.BlockSpec((tn, D), lambda i: (i, 0)),
        out_shape=jax.ShapeDtypeStruct((N, D), jnp.float32),
        compiler_params=pltpu.CompilerParams(
            dimension_semantics=("parallel",)),
    )(a, res, w, b.reshape(1, D), g.reshape(1, D), beta.reshape(1, D))


def _ffn_ln_kernel(x_ref, w1_ref, b1_ref, w2_ref, b2_ref, g_ref, beta_ref,
                   o_ref, *, eps):
    # out = LayerNorm(x + relu(x @ w1^T + b1) @ w2^T + b2)  -- fused FFN block.
    x = x_ref[...]
    h = jax.lax.dot_general(
        x.astype(jnp.bfloat16), w1_ref[...],
        (((1,), (1,)), ((), ())), preferred_element_type=jnp.float32) + b1_ref[...]
    h = jnp.maximum(h, 0.0)                      # ReLU (torch default activation)
    f = jax.lax.dot_general(
        h.astype(jnp.bfloat16), w2_ref[...],
        (((1,), (1,)), ((), ())), preferred_element_type=jnp.float32) + b2_ref[...]
    y = x + f
    o_ref[...] = _layernorm(y, g_ref[...], beta_ref[...], eps).astype(o_ref.dtype)


def ffn_ln(x, w1, b1, w2, b2, g, beta, *, eps=1e-5, row_tile=ROW_TILE):
    N, D = x.shape
    Hd = w1.shape[0]
    tn = min(N, row_tile)
    return pl.pallas_call(
        partial(_ffn_ln_kernel, eps=eps),
        grid=(pl.cdiv(N, tn),),
        in_specs=[pl.BlockSpec((tn, D), lambda i: (i, 0)),
                  pl.BlockSpec((Hd, D), lambda i: (0, 0)),
                  pl.BlockSpec((1, Hd), lambda i: (0, 0)),
                  pl.BlockSpec((D, Hd), lambda i: (0, 0)),
                  pl.BlockSpec((1, D), lambda i: (0, 0)),
                  pl.BlockSpec((1, D), lambda i: (0, 0)),
                  pl.BlockSpec((1, D), lambda i: (0, 0))],
        out_specs=pl.BlockSpec((tn, D), lambda i: (i, 0)),
        out_shape=jax.ShapeDtypeStruct((N, D), jnp.float32),
        compiler_params=pltpu.CompilerParams(
            dimension_semantics=("parallel",)),
    )(x, w1, b1.reshape(1, Hd), w2, b2.reshape(1, D),
      g.reshape(1, D), beta.reshape(1, D))


def _flash_attn_kernel(q_ref, k_ref, v_ref, o_ref, m_sc, l_sc, acc_sc,
                       *, scale, tq, tk):
    qi = pl.program_id(2)
    ki = pl.program_id(3)

    @pl.when(ki == 0)
    def _():
        m_sc[...] = jnp.full_like(m_sc, NEG_INF)
        l_sc[...] = jnp.zeros_like(l_sc)
        acc_sc[...] = jnp.zeros_like(acc_sc)

    # Fold softmax scale into q (O(S*Dh) instead of O(S*TK)).
    q = (q_ref[...].astype(jnp.float32) * scale).astype(jnp.bfloat16)   # (tq, Dh)
    s = jax.lax.dot_general(
        q, k_ref[...], (((1,), (1,)), ((), ())),
        preferred_element_type=jnp.float32)                             # (tq, tk)

    # Causal mask generated in-kernel (also masks any padded KV tail rows).
    row = qi * tq + jax.lax.broadcasted_iota(jnp.int32, s.shape, 0)
    col = ki * tk + jax.lax.broadcasted_iota(jnp.int32, s.shape, 1)
    s = jnp.where(col <= row, s, NEG_INF)

    m_prev = m_sc[...]
    m_new = jnp.maximum(m_prev, jnp.max(s, axis=-1, keepdims=True))
    alpha = jnp.exp(m_prev - m_new)
    p = jnp.exp(s - m_new)
    l_sc[...] = alpha * l_sc[...] + jnp.sum(p, axis=-1, keepdims=True)
    acc_sc[...] = alpha * acc_sc[...] + jax.lax.dot_general(
        p.astype(jnp.bfloat16), v_ref[...],
        (((1,), (0,)), ((), ())), preferred_element_type=jnp.float32)
    m_sc[...] = m_new

    @pl.when(ki == pl.num_programs(3) - 1)
    def _():
        o_ref[...] = (acc_sc[...] * pl.reciprocal(l_sc[...], approx=True)
                      ).astype(o_ref.dtype)


def flash_attention(q, k, v, *, scale,
                    q_tile=ATTN_Q_TILE, kv_tile=ATTN_KV_TILE):
    """q, k, v: (B, H, S, Dh) bf16. Causal self-attention, returns bf16."""
    B, H, S, Dh = q.shape
    tq = min(S, q_tile)
    tk = min(S, kv_tile)
    grid = (B, H, pl.cdiv(S, tq), pl.cdiv(S, tk))
    q_spec = pl.BlockSpec((None, None, tq, Dh), lambda b, h, qi, ki: (b, h, qi, 0))
    kv_spec = pl.BlockSpec((None, None, tk, Dh), lambda b, h, qi, ki: (b, h, ki, 0))
    return pl.pallas_call(
        partial(_flash_attn_kernel, scale=scale, tq=tq, tk=tk),
        grid=grid,
        in_specs=[q_spec, kv_spec, kv_spec],
        out_specs=pl.BlockSpec((None, None, tq, Dh),
                               lambda b, h, qi, ki: (b, h, qi, 0)),
        out_shape=jax.ShapeDtypeStruct((B, H, S, Dh), jnp.bfloat16),
        scratch_shapes=[pltpu.VMEM((tq, 1), jnp.float32),
                        pltpu.VMEM((tq, 1), jnp.float32),
                        pltpu.VMEM((tq, Dh), jnp.float32)],
        compiler_params=pltpu.CompilerParams(
            dimension_semantics=("parallel", "parallel", "parallel", "arbitrary")),
    )(q, k, v)


# ------------------------------ JAX glue ----------------------------------

def positional_encoding(S, D):
    position = jnp.arange(S, dtype=jnp.float32)[:, None]
    div_term = jnp.exp(jnp.arange(0, D, 2, dtype=jnp.float32)
                       * (-math.log(10000.0) / D))
    angles = position * div_term                 # (S, D//2)
    pe = jnp.stack([jnp.sin(angles), jnp.cos(angles)], axis=-1).reshape(S, D)
    return pe[:, None, :]                        # (S, 1, D), broadcasts over batch


def init_params(key, n_vocab, d_model, hidden_dim, num_layers):
    def w_init(k, shape):
        return (jax.random.normal(k, shape, jnp.float32) * 0.02).astype(jnp.bfloat16)

    keys = jax.random.split(key, 2 + num_layers)
    params = {
        "emb": jax.random.normal(keys[0], (n_vocab, d_model), jnp.float32) * 0.02,
        "out_w": w_init(keys[1], (n_vocab, d_model)),
        "out_b": jnp.zeros((n_vocab,), jnp.float32),
        "layers": [],
    }
    for l in range(num_layers):
        k = jax.random.split(keys[2 + l], 4)
        params["layers"].append(dict(
            in_proj_w=w_init(k[0], (3 * d_model, d_model)),
            in_proj_b=jnp.zeros((3 * d_model,), jnp.float32),
            out_proj_w=w_init(k[1], (d_model, d_model)),
            out_proj_b=jnp.zeros((d_model,), jnp.float32),
            w1=w_init(k[2], (hidden_dim, d_model)),
            b1=jnp.zeros((hidden_dim,), jnp.float32),
            w2=w_init(k[3], (d_model, hidden_dim)),
            b2=jnp.zeros((d_model,), jnp.float32),
            ln1_g=jnp.ones((d_model,), jnp.float32),
            ln1_b=jnp.zeros((d_model,), jnp.float32),
            ln2_g=jnp.ones((d_model,), jnp.float32),
            ln2_b=jnp.zeros((d_model,), jnp.float32),
        ))
    return params


def net_forward(params, src, *, nhead):
    # src: (B, S) int32 token ids; PyTorch does src.t() -> (S, B)
    src_t = src.T
    S, B = src_t.shape
    D = params["emb"].shape[1]
    n_vocab = params["out_w"].shape[0]
    Dh = D // nhead
    scale = 1.0 / math.sqrt(Dh)
    N = S * B

    # Embedding lookup (gather) + positional encoding; dropout = identity.
    x = jnp.take(params["emb"], src_t, axis=0)   # (S, B, D) f32
    x = x + positional_encoding(S, D)

    for p in params["layers"]:
        xf = x.reshape(N, D)
        # ---- multi-head self-attention (packed QKV projection, bf16 out) ----
        qkv = linear(xf, p["in_proj_w"], p["in_proj_b"],
                     out_dtype=jnp.bfloat16)                 # (N, 3D) bf16
        # TODO(synk): the BHSD permutes below are XLA transposes; they could be
        # folded into the attention BlockSpec index_maps to avoid the copies.
        qkv_r = qkv.reshape(S, B, 3, nhead, Dh).transpose(2, 1, 3, 0, 4)
        attn = flash_attention(qkv_r[0], qkv_r[1], qkv_r[2], scale=scale)
        attn = attn.transpose(2, 0, 1, 3).reshape(N, D)      # back to (S*B, D)
        # ---- out_proj + residual + LayerNorm (fused epilogue) ----
        x1 = proj_add_ln(attn, xf, p["out_proj_w"], p["out_proj_b"],
                         p["ln1_g"], p["ln1_b"])
        # ---- FFN + residual + LayerNorm (fused) ----
        x2 = ffn_ln(x1, p["w1"], p["b1"], p["w2"], p["b2"],
                    p["ln2_g"], p["ln2_b"])
        x = x2.reshape(S, B, D)

    # Final vocab projection, tiled over tokens and lane-dense vocab columns.
    out = linear(x.reshape(N, D), params["out_w"], params["out_b"],
                 col_tile=VOCAB_COL_TILE)
    return out.reshape(S, B, n_vocab)            # matches PyTorch (S, B, n_vocab)


if __name__ == "__main__":
    n_vocab, d_model, hidden_dim = 64, 32, 64
    nhead, num_layers = 4, 2
    B, S = 2, 8

    key = jax.random.PRNGKey(0)
    pkey, dkey = jax.random.split(key)
    params = init_params(pkey, n_vocab, d_model, hidden_dim, num_layers)
    src = jax.random.randint(dkey, (B, S), 0, n_vocab, dtype=jnp.int32)

    fwd = jax.jit(partial(net_forward, nhead=nhead))
    out = fwd(params, src)
    jax.block_until_ready(out)
    assert out.shape == (S, B, n_vocab)
    assert bool(jnp.all(jnp.isfinite(out)))
    print("KERNEL_OK")
</pallas_src>

<mosaic_0001>
module attributes {stable_mosaic.version = 11 : i64} {
  func.func @_linear_kernel(%arg0: i32, %arg1: i32, %arg2: memref<16x32xf32, #tpu.memory_space<vmem>>, %arg3: memref<96x32xbf16, #tpu.memory_space<vmem>>, %arg4: memref<1x96xf32, #tpu.memory_space<vmem>>, %arg5: memref<16x96xbf16, #tpu.memory_space<vmem>>) attributes {dimension_semantics = [#tpu.dimension_semantics<parallel>, #tpu.dimension_semantics<parallel>], iteration_bounds = array<i64: 1, 1>, scalar_prefetch = 0 : i64, scratch_operands = 0 : i64, tpu.core_type = #tpu.core_type<tc>, window_params = [{transform_indices = @transform_0, window_bounds = array<i64: 16, 32>}, {transform_indices = @transform_1, window_bounds = array<i64: 96, 32>}, {transform_indices = @transform_2, window_bounds = array<i64: 1, 96>}, {transform_indices = @transform_3, window_bounds = array<i64: 16, 96>}]} {
    %c0 = arith.constant 0 : index
    %c0_0 = arith.constant 0 : index
    %0 = vector.load %arg2[%c0, %c0_0] : memref<16x32xf32, #tpu.memory_space<vmem>>, vector<16x32xf32>
    %1 = arith.truncf %0 : vector<16x32xf32> to vector<16x32xbf16>
    %c0_1 = arith.constant 0 : index
    %c0_2 = arith.constant 0 : index
    %2 = vector.load %arg3[%c0_1, %c0_2] : memref<96x32xbf16, #tpu.memory_space<vmem>>, vector<96x32xbf16>
    %cst = arith.constant dense<0.000000e+00> : vector<16x96xf32>
    %3 = tpu.matmul %1, %2, %cst {dimension_numbers = #tpu.dot_dimension_numbers<[1], [1], [0], [0], [0, 0, 1, 0], [], []>} : vector<16x32xbf16>, vector<96x32xbf16>, vector<16x96xf32> -> vector<16x96xf32>
    %c0_3 = arith.constant 0 : index
    %c0_4 = arith.constant 0 : index
    %4 = vector.load %arg4[%c0_3, %c0_4] : memref<1x96xf32, #tpu.memory_space<vmem>>, vector<1x96xf32>
    %5 = vector.broadcast %4 : vector<1x96xf32> to vector<16x96xf32>
    %6 = arith.addf %3, %5 : vector<16x96xf32>
    %7 = arith.truncf %6 : vector<16x96xf32> to vector<16x96xbf16>
    %c0_5 = arith.constant 0 : index
    %c0_6 = arith.constant 0 : index
    %8 = vector.load %arg5[%c0_5, %c0_6] : memref<16x96xbf16, #tpu.memory_space<vmem>>, vector<16x96xbf16>
    tpu.vector_store %arg5[%c0_5, %c0_6], %7 {strides = array<i32>} : memref<16x96xbf16, #tpu.memory_space<vmem>>, vector<16x96xbf16>,
    return
  }
  func.func @transform_0(%arg0: i32, %arg1: i32) -> (i32, i32) {
    %c0_i32 = arith.constant 0 : i32
    %c0_i32_0 = arith.constant 0 : i32
    return %arg0, %c0_i32 : i32, i32
  }
  func.func @transform_1(%arg0: i32, %arg1: i32) -> (i32, i32) {
    %c0_i32 = arith.constant 0 : i32
    %c0_i32_0 = arith.constant 0 : i32
    return %arg1, %c0_i32 : i32, i32
  }
  func.func @transform_2(%arg0: i32, %arg1: i32) -> (i32, i32) {
    %c0_i32 = arith.constant 0 : i32
    %c0_i32_0 = arith.constant 0 : i32
    return %c0_i32, %arg1 : i32, i32
  }
  func.func @transform_3(%arg0: i32, %arg1: i32) -> (i32, i32) {
    %c0_i32 = arith.constant 0 : i32
    return %arg0, %arg1 : i32, i32
  }
}

module attributes {stable_mosaic.version = 11 : i64} {
  func.func @_flash_attn_kernel(%arg0: i32, %arg1: i32, %arg2: i32, %arg3: i32, %arg4: memref<1x1x8x8xbf16, #tpu.memory_space<vmem>>, %arg5: memref<1x1x8x8xbf16, #tpu.memory_space<vmem>>, %arg6: memref<1x1x8x8xbf16, #tpu.memory_space<vmem>>, %arg7: memref<1x1x8x8xbf16, #tpu.memory_space<vmem>>, %arg8: memref<8x1xf32, #tpu.memory_space<vmem>>, %arg9: memref<8x1xf32, #tpu.memory_space<vmem>>, %arg10: memref<8x8xf32, #tpu.memory_space<vmem>>) attributes {dimension_semantics = [#tpu.dimension_semantics<parallel>, #tpu.dimension_semantics<parallel>, #tpu.dimension_semantics<parallel>, #tpu.dimension_semantics<arbitrary>], iteration_bounds = array<i64: 2, 4, 1, 1>, scalar_prefetch = 0 : i64, scratch_operands = 3 : i64, tpu.core_type = #tpu.core_type<tc>, window_params = [{transform_indices = @transform_0, window_bounds = array<i64: 1, 1, 8, 8>}, {transform_indices = @transform_1, window_bounds = array<i64: 1, 1, 8, 8>}, {transform_indices = @transform_2, window_bounds = array<i64: 1, 1, 8, 8>}, {transform_indices = @transform_3, window_bounds = array<i64: 1, 1, 8, 8>}]} {
    %c0_i32 = arith.constant 0 : i32
    %0 = arith.cmpi eq, %arg3, %c0_i32 : i32
    %1 = arith.extui %0 : i1 to i32
    %c0_i32_0 = arith.constant 0 : i32
    %2 = arith.cmpi ne, %1, %c0_i32_0 : i32
    scf.if %2 {
      %cst_32 = arith.constant -1.000000e+30 : f32
      %51 = vector.broadcast %cst_32 : f32 to vector<8x1xf32>
      %c0_33 = arith.constant 0 : index
      %c0_34 = arith.constant 0 : index
      %52 = vector.load %arg8[%c0_33, %c0_34] : memref<8x1xf32, #tpu.memory_space<vmem>>, vector<8x1xf32>
      tpu.vector_store %arg8[%c0_33, %c0_34], %51 {strides = array<i32>} : memref<8x1xf32, #tpu.memory_space<vmem>>, vector<8x1xf32>,
      %cst_35 = arith.constant 0.000000e+00 : f32
      %53 = vector.broadcast %cst_35 : f32 to vector<8x1xf32>
      %c0_36 = arith.constant 0 : index
      %c0_37 = arith.constant 0 : index
      %54 = vector.load %arg9[%c0_36, %c0_37] : memref<8x1xf32, #tpu.memory_space<vmem>>, vector<8x1xf32>
      tpu.vector_store %arg9[%c0_36, %c0_37], %53 {strides = array<i32>} : memref<8x1xf32, #tpu.memory_space<vmem>>, vector<8x1xf32>,
      %cst_38 = arith.constant 0.000000e+00 : f32
      %55 = vector.broadcast %cst_38 : f32 to vector<8x8xf32>
      %c0_39 = arith.constant 0 : index
      %c0_40 = arith.constant 0 : index
      %56 = vector.load %arg10[%c0_39, %c0_40] : memref<8x8xf32, #tpu.memory_space<vmem>>, vector<8x8xf32>
      tpu.vector_store %arg10[%c0_39, %c0_40], %55 {strides = array<i32>} : memref<8x8xf32, #tpu.memory_space<vmem>>, vector<8x8xf32>,
    } else {
    }
    %c0 = arith.constant 0 : index
    %c0_1 = arith.constant 0 : index
    %c0_2 = arith.constant 0 : index
    %c0_3 = arith.constant 0 : index
    %3 = vector.load %arg4[%c0, %c0_1, %c0_2, %c0_3] : memref<1x1x8x8xbf16, #tpu.memory_space<vmem>>, vector<1x1x8x8xbf16>
    %4 = vector.shape_cast %3 : vector<1x1x8x8xbf16> to vector<8x8xbf16>
    %5 = arith.extf %4 : vector<8x8xbf16> to vector<8x8xf32>
    %cst = arith.constant 0.353553385 : f32
    %6 = vector.broadcast %cst : f32 to vector<8x8xf32>
    %7 = arith.mulf %5, %6 : vector<8x8xf32>
    %8 = arith.truncf %7 : vector<8x8xf32> to vector<8x8xbf16>
    %c0_4 = arith.constant 0 : index
    %c0_5 = arith.constant 0 : index
    %c0_6 = arith.constant 0 : index
    %c0_7 = arith.constant 0 : index
    %9 = vector.load %arg5[%c0_4, %c0_5, %c0_6, %c0_7] : memref<1x1x8x8xbf16, #tpu.memory_space<vmem>>, vector<1x1x8x8xbf16>
    %10 = vector.shape_cast %9 : vector<1x1x8x8xbf16> to vector<8x8xbf16>
    %cst_8 = arith.constant dense<0.000000e+00> : vector<8x8xf32>
    %11 = tpu.matmul %8, %10, %cst_8 {dimension_numbers = #tpu.dot_dimension_numbers<[1], [1], [0], [0], [0, 0, 1, 0], [], []>} : vector<8x8xbf16>, vector<8x8xbf16>, vector<8x8xf32> -> vector<8x8xf32>
    %c8_i32 = arith.constant 8 : i32
    %12 = arith.muli %arg2, %c8_i32 : i32
    %13 = tpu.iota {dimensions = array<i32: 0>} : vector<8x8xi32>
    %14 = vector.broadcast %12 : i32 to vector<8x8xi32>
    %15 = arith.addi %14, %13 : vector<8x8xi32>
    %c8_i32_9 = arith.constant 8 : i32
    %16 = arith.muli %arg3, %c8_i32_9 : i32
    %17 = tpu.iota {dimensions = array<i32: 1>} : vector<8x8xi32>
    %18 = vector.broadcast %16 : i32 to vector<8x8xi32>
    %19 = arith.addi %18, %17 : vector<8x8xi32>
    %20 = arith.cmpi sle, %19, %15 : vector<8x8xi32>
    %cst_10 = arith.constant -1.000000e+30 : f32
    %21 = vector.broadcast %cst_10 : f32 to vector<8x8xf32>
    %22 = arith.select %20, %11, %21 : vector<8x8xi1>, vector<8x8xf32>
    %c0_11 = arith.constant 0 : index
    %c0_12 = arith.constant 0 : index
    %23 = vector.load %arg8[%c0_11, %c0_12] : memref<8x1xf32, #tpu.memory_space<vmem>>, vector<8x1xf32>
    %cst_13 = arith.constant dense<0xFF800000> : vector<8xf32>
    %24 = vector.multi_reduction <maximumf>, %22, %cst_13 [1] : vector<8x8xf32> to vector<8xf32>
    %25 = vector.shape_cast %24 : vector<8xf32> to vector<8x1xf32>
    %26 = arith.maximumf %23, %25 : vector<8x1xf32>
    %27 = arith.subf %23, %26 : vector<8x1xf32>
    %28 = math.exp %27 : vector<8x1xf32>
    %29 = vector.broadcast %26 : vector<8x1xf32> to vector<8x8xf32>
    %30 = arith.subf %22, %29 : vector<8x8xf32>
    %31 = math.exp %30 : vector<8x8xf32>
    %c0_14 = arith.constant 0 : index
    %c0_15 = arith.constant 0 : index
    %32 = vector.load %arg9[%c0_14, %c0_15] : memref<8x1xf32, #tpu.memory_space<vmem>>, vector<8x1xf32>
    %33 = arith.mulf %28, %32 : vector<8x1xf32>
    %cst_16 = arith.constant dense<0.000000e+00> : vector<8xf32>
    %34 = vector.multi_reduction <add>, %31, %cst_16 [1] : vector<8x8xf32> to vector<8xf32>
    %35 = vector.shape_cast %34 : vector<8xf32> to vector<8x1xf32>
    %36 = arith.addf %33, %35 : vector<8x1xf32>
    %c0_17 = arith.constant 0 : index
    %c0_18 = arith.constant 0 : index
    %37 = vector.load %arg9[%c0_17, %c0_18] : memref<8x1xf32, #tpu.memory_space<vmem>>, vector<8x1xf32>
    tpu.vector_store %arg9[%c0_17, %c0_18], %36 {strides = array<i32>} : memref<8x1xf32, #tpu.memory_space<vmem>>, vector<8x1xf32>,
    %c0_19 = arith.constant 0 : index
    %c0_20 = arith.constant 0 : index
    %38 = vector.load %arg10[%c0_19, %c0_20] : memref<8x8xf32, #tpu.memory_space<vmem>>, vector<8x8xf32>
    %39 = vector.broadcast %28 : vector<8x1xf32> to vector<8x8xf32>
    %40 = arith.mulf %39, %38 : vector<8x8xf32>
    %41 = arith.truncf %31 : vector<8x8xf32> to vector<8x8xbf16>
    %c0_21 = arith.constant 0 : index
    %c0_22 = arith.constant 0 : index
    %c0_23 = arith.constant 0 : index
    %c0_24 = arith.constant 0 : index
    %42 = vector.load %arg6[%c0_21, %c0_22, %c0_23, %c0_24] : memref<1x1x8x8xbf16, #tpu.memory_space<vmem>>, vector<1x1x8x8xbf16>
    %43 = vector.shape_cast %42 : vector<1x1x8x8xbf16> to vector<8x8xbf16>
    %cst_25 = arith.constant dense<0.000000e+00> : vector<8x8xf32>
    %44 = tpu.matmul %41, %43, %cst_25 {dimension_numbers = #tpu.dot_dimension_numbers<[1], [0], [0], [1], [0, 0, 1, 1], [], []>} : vector<8x8xbf16>, vector<8x8xbf16>, vector<8x8xf32> -> vector<8x8xf32>
    %45 = arith.addf %40, %44 : vector<8x8xf32>
    %c0_26 = arith.constant 0 : index
    %c0_27 = arith.constant 0 : index
    %46 = vector.load %arg10[%c0_26, %c0_27] : memref<8x8xf32, #tpu.memory_space<vmem>>, vector<8x8xf32>
    tpu.vector_store %arg10[%c0_26, %c0_27], %45 {strides = array<i32>} : memref<8x8xf32, #tpu.memory_space<vmem>>, vector<8x8xf32>,
    %c0_28 = arith.constant 0 : index
    %c0_29 = arith.constant 0 : index
    %47 = vector.load %arg8[%c0_28, %c0_29] : memref<8x1xf32, #tpu.memory_space<vmem>>, vector<8x1xf32>
    tpu.vector_store %arg8[%c0_28, %c0_29], %26 {strides = array<i32>} : memref<8x1xf32, #tpu.memory_space<vmem>>, vector<8x1xf32>,
    %c0_i32_30 = arith.constant 0 : i32
    %48 = arith.cmpi eq, %arg3, %c0_i32_30 : i32
    %49 = arith.extui %48 : i1 to i32
    %c0_i32_31 = arith.constant 0 : i32
    %50 = arith.cmpi ne, %49, %c0_i32_31 : i32
    scf.if %50 {
      %c0_32 = arith.constant 0 : index
      %c0_33 = arith.constant 0 : index
      %51 = vector.load %arg10[%c0_32, %c0_33] : memref<8x8xf32, #tpu.memory_space<vmem>>, vector<8x8xf32>
      %c0_34 = arith.constant 0 : index
      %c0_35 = arith.constant 0 : index
      %52 = vector.load %arg9[%c0_34, %c0_35] : memref<8x1xf32, #tpu.memory_space<vmem>>, vector<8x1xf32>
      %53 = tpu.reciprocal %52 {approx = true} : vector<8x1xf32> -> vector<8x1xf32>
      %54 = vector.broadcast %53 : vector<8x1xf32> to vector<8x8xf32>
      %55 = arith.mulf %51, %54 : vector<8x8xf32>
      %56 = arith.truncf %55 : vector<8x8xf32> to vector<8x8xbf16>
      %c0_36 = arith.constant 0 : index
      %c0_37 = arith.constant 0 : index
      %c0_38 = arith.constant 0 : index
      %c0_39 = arith.constant 0 : index
      %57 = vector.load %arg7[%c0_36, %c0_37, %c0_38, %c0_39] : memref<1x1x8x8xbf16, #tpu.memory_space<vmem>>, vector<1x1x8x8xbf16>
      %58 = vector.shape_cast %57 : vector<1x1x8x8xbf16> to vector<8x8xbf16>
      %59 = vector.shape_cast %56 : vector<8x8xbf16> to vector<1x1x8x8xbf16>
      tpu.vector_store %arg7[%c0_36, %c0_37, %c0_38, %c0_39], %59 {strides = array<i32>} : memref<1x1x8x8xbf16, #tpu.memory_space<vmem>>, vector<1x1x8x8xbf16>,
    } else {
    }
    return
  }
  func.func @transform_0(%arg0: i32, %arg1: i32, %arg2: i32, %arg3: i32) -> (i32, i32, i32, i32) {
    %c0_i32 = arith.constant 0 : i32
    %c0_i32_0 = arith.constant 0 : i32
    return %arg0, %arg1, %arg2, %c0_i32 : i32, i32, i32, i32
  }
  func.func @transform_1(%arg0: i32, %arg1: i32, %arg2: i32, %arg3: i32) -> (i32, i32, i32, i32) {
    %c0_i32 = arith.constant 0 : i32
    %c0_i32_0 = arith.constant 0 : i32
    return %arg0, %arg1, %arg3, %c0_i32 : i32, i32, i32, i32
  }
  func.func @transform_2(%arg0: i32, %arg1: i32, %arg2: i32, %arg3: i32) -> (i32, i32, i32, i32) {
    %c0_i32 = arith.constant 0 : i32
    %c0_i32_0 = arith.constant 0 : i32
    return %arg0, %arg1, %arg3, %c0_i32 : i32, i32, i32, i32
  }
  func.func @transform_3(%arg0: i32, %arg1: i32, %arg2: i32, %arg3: i32) -> (i32, i32, i32, i32) {
    %c0_i32 = arith.constant 0 : i32
    %c0_i32_0 = arith.constant 0 : i32
    return %arg0, %arg1, %arg2, %c0_i32 : i32, i32, i32, i32
  }
}

module attributes {stable_mosaic.version = 11 : i64} {
  func.func @_proj_add_ln_kernel(%arg0: i32, %arg1: memref<16x32xbf16, #tpu.memory_space<vmem>>, %arg2: memref<16x32xf32, #tpu.memory_space<vmem>>, %arg3: memref<32x32xbf16, #tpu.memory_space<vmem>>, %arg4: memref<1x32xf32, #tpu.memory_space<vmem>>, %arg5: memref<1x32xf32, #tpu.memory_space<vmem>>, %arg6: memref<1x32xf32, #tpu.memory_space<vmem>>, %arg7: memref<16x32xf32, #tpu.memory_space<vmem>>) attributes {dimension_semantics = [#tpu.dimension_semantics<parallel>], iteration_bounds = array<i64: 1>, scalar_prefetch = 0 : i64, scratch_operands = 0 : i64, tpu.core_type = #tpu.core_type<tc>, window_params = [{transform_indices = @transform_0, window_bounds = array<i64: 16, 32>}, {transform_indices = @transform_1, window_bounds = array<i64: 16, 32>}, {pipeline_mode = #tpu.pipeline_mode<synchronous>, transform_indices = @transform_2, window_bounds = array<i64: 32, 32>}, {pipeline_mode = #tpu.pipeline_mode<synchronous>, transform_indices = @transform_3, window_bounds = array<i64: 1, 32>}, {pipeline_mode = #tpu.pipeline_mode<synchronous>, transform_indices = @transform_4, window_bounds = array<i64: 1, 32>}, {pipeline_mode = #tpu.pipeline_mode<synchronous>, transform_indices = @transform_5, window_bounds = array<i64: 1, 32>}, {transform_indices = @transform_6, window_bounds = array<i64: 16, 32>}]} {
    %c0 = arith.constant 0 : index
    %c0_0 = arith.constant 0 : index
    %0 = vector.load %arg1[%c0, %c0_0] : memref<16x32xbf16, #tpu.memory_space<vmem>>, vector<16x32xbf16>
    %c0_1 = arith.constant 0 : index
    %c0_2 = arith.constant 0 : index
    %1 = vector.load %arg3[%c0_1, %c0_2] : memref<32x32xbf16, #tpu.memory_space<vmem>>, vector<32x32xbf16>
    %cst = arith.constant dense<0.000000e+00> : vector<16x32xf32>
    %2 = tpu.matmul %0, %1, %cst {dimension_numbers = #tpu.dot_dimension_numbers<[1], [1], [0], [0], [0, 0, 1, 0], [], []>} : vector<16x32xbf16>, vector<32x32xbf16>, vector<16x32xf32> -> vector<16x32xf32>
    %c0_3 = arith.constant 0 : index
    %c0_4 = arith.constant 0 : index
    %3 = vector.load %arg2[%c0_3, %c0_4] : memref<16x32xf32, #tpu.memory_space<vmem>>, vector<16x32xf32>
    %4 = arith.addf %3, %2 : vector<16x32xf32>
    %c0_5 = arith.constant 0 : index
    %c0_6 = arith.constant 0 : index
    %5 = vector.load %arg4[%c0_5, %c0_6] : memref<1x32xf32, #tpu.memory_space<vmem>>, vector<1x32xf32>
    %6 = vector.broadcast %5 : vector<1x32xf32> to vector<16x32xf32>
    %7 = arith.addf %4, %6 : vector<16x32xf32>
    %c0_7 = arith.constant 0 : index
    %c0_8 = arith.constant 0 : index
    %8 = vector.load %arg5[%c0_7, %c0_8] : memref<1x32xf32, #tpu.memory_space<vmem>>, vector<1x32xf32>
    %c0_9 = arith.constant 0 : index
    %c0_10 = arith.constant 0 : index
    %9 = vector.load %arg6[%c0_9, %c0_10] : memref<1x32xf32, #tpu.memory_space<vmem>>, vector<1x32xf32>
    %cst_11 = arith.constant dense<0.000000e+00> : vector<16xf32>
    %10 = vector.multi_reduction <add>, %7, %cst_11 [1] : vector<16x32xf32> to vector<16xf32>
    %11 = vector.shape_cast %10 : vector<16xf32> to vector<16x1xf32>
    %cst_12 = arith.constant 3.200000e+01 : f32
    %12 = vector.broadcast %cst_12 : f32 to vector<16x1xf32>
    %13 = arith.divf %11, %12 : vector<16x1xf32>
    %14 = vector.broadcast %13 : vector<16x1xf32> to vector<16x32xf32>
    %15 = arith.subf %7, %14 : vector<16x32xf32>
    %16 = arith.mulf %15, %15 : vector<16x32xf32>
    %cst_13 = arith.constant dense<0.000000e+00> : vector<16xf32>
    %17 = vector.multi_reduction <add>, %16, %cst_13 [1] : vector<16x32xf32> to vector<16xf32>
    %18 = vector.shape_cast %17 : vector<16xf32> to vector<16x1xf32>
    %cst_14 = arith.constant 3.200000e+01 : f32
    %19 = vector.broadcast %cst_14 : f32 to vector<16x1xf32>
    %20 = arith.divf %18, %19 : vector<16x1xf32>
    %21 = vector.broadcast %13 : vector<16x1xf32> to vector<16x32xf32>
    %22 = arith.subf %7, %21 : vector<16x32xf32>
    %cst_15 = arith.constant 9.99999974E-6 : f32
    %23 = vector.broadcast %cst_15 : f32 to vector<16x1xf32>
    %24 = arith.addf %20, %23 : vector<16x1xf32>
    %25 = math.rsqrt %24 : vector<16x1xf32>
    %26 = vector.broadcast %25 : vector<16x1xf32> to vector<16x32xf32>
    %27 = arith.mulf %22, %26 : vector<16x32xf32>
    %28 = vector.broadcast %8 : vector<1x32xf32> to vector<16x32xf32>
    %29 = arith.mulf %27, %28 : vector<16x32xf32>
    %30 = vector.broadcast %9 : vector<1x32xf32> to vector<16x32xf32>
    %31 = arith.addf %29, %30 : vector<16x32xf32>
    %c0_16 = arith.constant 0 : index
    %c0_17 = arith.constant 0 : index
    %32 = vector.load %arg7[%c0_16, %c0_17] : memref<16x32xf32, #tpu.memory_space<vmem>>, vector<16x32xf32>
    tpu.vector_store %arg7[%c0_16, %c0_17], %31 {strides = array<i32>} : memref<16x32xf32, #tpu.memory_space<vmem>>, vector<16x32xf32>,
    return
  }
  func.func @transform_0(%arg0: i32) -> (i32, i32) {
    %c0_i32 = arith.constant 0 : i32
    %c0_i32_0 = arith.constant 0 : i32
    return %arg0, %c0_i32 : i32, i32
  }
  func.func @transform_1(%arg0: i32) -> (i32, i32) {
    %c0_i32 = arith.constant 0 : i32
    %c0_i32_0 = arith.constant 0 : i32
    return %arg0, %c0_i32 : i32, i32
  }
  func.func @transform_2(%arg0: i32) -> (i32, i32) {
    %c0_i32 = arith.constant 0 : i32
    %c0_i32_0 = arith.constant 0 : i32
    %c0_i32_1 = arith.constant 0 : i32
    return %c0_i32, %c0_i32_0 : i32, i32
  }
  func.func @transform_3(%arg0: i32) -> (i32, i32) {
    %c0_i32 = arith.constant 0 : i32
    %c0_i32_0 = arith.constant 0 : i32
    %c0_i32_1 = arith.constant 0 : i32
    return %c0_i32, %c0_i32_0 : i32, i32
  }
  func.func @transform_4(%arg0: i32) -> (i32, i32) {
    %c0_i32 = arith.constant 0 : i32
    %c0_i32_0 = arith.constant 0 : i32
    %c0_i32_1 = arith.constant 0 : i32
    return %c0_i32, %c0_i32_0 : i32, i32
  }
  func.func @transform_5(%arg0: i32) -> (i32, i32) {
    %c0_i32 = arith.constant 0 : i32
    %c0_i32_0 = arith.constant 0 : i32
    %c0_i32_1 = arith.constant 0 : i32
    return %c0_i32, %c0_i32_0 : i32, i32
  }
  func.func @transform_6(%arg0: i32) -> (i32, i32) {
    %c0_i32 = arith.constant 0 : i32
    %c0_i32_0 = arith.constant 0 : i32
    return %arg0, %c0_i32 : i32, i32
  }
}

module attributes {stable_mosaic.version = 11 : i64} {
  func.func @_ffn_ln_kernel(%arg0: i32, %arg1: memref<16x32xf32, #tpu.memory_space<vmem>>, %arg2: memref<64x32xbf16, #tpu.memory_space<vmem>>, %arg3: memref<1x64xf32, #tpu.memory_space<vmem>>, %arg4: memref<32x64xbf16, #tpu.memory_space<vmem>>, %arg5: memref<1x32xf32, #tpu.memory_space<vmem>>, %arg6: memref<1x32xf32, #tpu.memory_space<vmem>>, %arg7: memref<1x32xf32, #tpu.memory_space<vmem>>, %arg8: memref<16x32xf32, #tpu.memory_space<vmem>>) attributes {dimension_semantics = [#tpu.dimension_semantics<parallel>], iteration_bounds = array<i64: 1>, scalar_prefetch = 0 : i64, scratch_operands = 0 : i64, tpu.core_type = #tpu.core_type<tc>, window_params = [{transform_indices = @transform_0, window_bounds = array<i64: 16, 32>}, {pipeline_mode = #tpu.pipeline_mode<synchronous>, transform_indices = @transform_1, window_bounds = array<i64: 64, 32>}, {pipeline_mode = #tpu.pipeline_mode<synchronous>, transform_indices = @transform_2, window_bounds = array<i64: 1, 64>}, {pipeline_mode = #tpu.pipeline_mode<synchronous>, transform_indices = @transform_3, window_bounds = array<i64: 32, 64>}, {pipeline_mode = #tpu.pipeline_mode<synchronous>, transform_indices = @transform_4, window_bounds = array<i64: 1, 32>}, {pipeline_mode = #tpu.pipeline_mode<synchronous>, transform_indices = @transform_5, window_bounds = array<i64: 1, 32>}, {pipeline_mode = #tpu.pipeline_mode<synchronous>, transform_indices = @transform_6, window_bounds = array<i64: 1, 32>}, {transform_indices = @transform_7, window_bounds = array<i64: 16, 32>}]} {
    %c0 = arith.constant 0 : index
    %c0_0 = arith.constant 0 : index
    %0 = vector.load %arg1[%c0, %c0_0] : memref<16x32xf32, #tpu.memory_space<vmem>>, vector<16x32xf32>
    %1 = arith.truncf %0 : vector<16x32xf32> to vector<16x32xbf16>
    %c0_1 = arith.constant 0 : index
    %c0_2 = arith.constant 0 : index
    %2 = vector.load %arg2[%c0_1, %c0_2] : memref<64x32xbf16, #tpu.memory_space<vmem>>, vector<64x32xbf16>
    %cst = arith.constant dense<0.000000e+00> : vector<16x64xf32>
    %3 = tpu.matmul %1, %2, %cst {dimension_numbers = #tpu.dot_dimension_numbers<[1], [1], [0], [0], [0, 0, 1, 0], [], []>} : vector<16x32xbf16>, vector<64x32xbf16>, vector<16x64xf32> -> vector<16x64xf32>
    %c0_3 = arith.constant 0 : index
    %c0_4 = arith.constant 0 : index
    %4 = vector.load %arg3[%c0_3, %c0_4] : memref<1x64xf32, #tpu.memory_space<vmem>>, vector<1x64xf32>
    %5 = vector.broadcast %4 : vector<1x64xf32> to vector<16x64xf32>
    %6 = arith.addf %3, %5 : vector<16x64xf32>
    %cst_5 = arith.constant 0.000000e+00 : f32
    %7 = vector.broadcast %cst_5 : f32 to vector<16x64xf32>
    %8 = arith.maximumf %6, %7 : vector<16x64xf32>
    %9 = arith.truncf %8 : vector<16x64xf32> to vector<16x64xbf16>
    %c0_6 = arith.constant 0 : index
    %c0_7 = arith.constant 0 : index
    %10 = vector.load %arg4[%c0_6, %c0_7] : memref<32x64xbf16, #tpu.memory_space<vmem>>, vector<32x64xbf16>
    %cst_8 = arith.constant dense<0.000000e+00> : vector<16x32xf32>
    %11 = tpu.matmul %9, %10, %cst_8 {dimension_numbers = #tpu.dot_dimension_numbers<[1], [1], [0], [0], [0, 0, 1, 0], [], []>} : vector<16x64xbf16>, vector<32x64xbf16>, vector<16x32xf32> -> vector<16x32xf32>
    %c0_9 = arith.constant 0 : index
    %c0_10 = arith.constant 0 : index
    %12 = vector.load %arg5[%c0_9, %c0_10] : memref<1x32xf32, #tpu.memory_space<vmem>>, vector<1x32xf32>
    %13 = vector.broadcast %12 : vector<1x32xf32> to vector<16x32xf32>
    %14 = arith.addf %11, %13 : vector<16x32xf32>
    %15 = arith.addf %0, %14 : vector<16x32xf32>
    %c0_11 = arith.constant 0 : index
    %c0_12 = arith.constant 0 : index
    %16 = vector.load %arg6[%c0_11, %c0_12] : memref<1x32xf32, #tpu.memory_space<vmem>>, vector<1x32xf32>
    %c0_13 = arith.constant 0 : index
    %c0_14 = arith.constant 0 : index
    %17 = vector.load %arg7[%c0_13, %c0_14] : memref<1x32xf32, #tpu.memory_space<vmem>>, vector<1x32xf32>
    %cst_15 = arith.constant dense<0.000000e+00> : vector<16xf32>
    %18 = vector.multi_reduction <add>, %15, %cst_15 [1] : vector<16x32xf32> to vector<16xf32>
    %19 = vector.shape_cast %18 : vector<16xf32> to vector<16x1xf32>
    %cst_16 = arith.constant 3.200000e+01 : f32
    %20 = vector.broadcast %cst_16 : f32 to vector<16x1xf32>
    %21 = arith.divf %19, %20 : vector<16x1xf32>
    %22 = vector.broadcast %21 : vector<16x1xf32> to vector<16x32xf32>
    %23 = arith.subf %15, %22 : vector<16x32xf32>
    %24 = arith.mulf %23, %23 : vector<16x32xf32>
    %cst_17 = arith.constant dense<0.000000e+00> : vector<16xf32>
    %25 = vector.multi_reduction <add>, %24, %cst_17 [1] : vector<16x32xf32> to vector<16xf32>
    %26 = vector.shape_cast %25 : vector<16xf32> to vector<16x1xf32>
    %cst_18 = arith.constant 3.200000e+01 : f32
    %27 = vector.broadcast %cst_18 : f32 to vector<16x1xf32>
    %28 = arith.divf %26, %27 : vector<16x1xf32>
    %29 = vector.broadcast %21 : vector<16x1xf32> to vector<16x32xf32>
    %30 = arith.subf %15, %29 : vector<16x32xf32>
    %cst_19 = arith.constant 9.99999974E-6 : f32
    %31 = vector.broadcast %cst_19 : f32 to vector<16x1xf32>
    %32 = arith.addf %28, %31 : vector<16x1xf32>
    %33 = math.rsqrt %32 : vector<16x1xf32>
    %34 = vector.broadcast %33 : vector<16x1xf32> to vector<16x32xf32>
    %35 = arith.mulf %30, %34 : vector<16x32xf32>
    %36 = vector.broadcast %16 : vector<1x32xf32> to vector<16x32xf32>
    %37 = arith.mulf %35, %36 : vector<16x32xf32>
    %38 = vector.broadcast %17 : vector<1x32xf32> to vector<16x32xf32>
    %39 = arith.addf %37, %38 : vector<16x32xf32>
    %c0_20 = arith.constant 0 : index
    %c0_21 = arith.constant 0 : index
    %40 = vector.load %arg8[%c0_20, %c0_21] : memref<16x32xf32, #tpu.memory_space<vmem>>, vector<16x32xf32>
    tpu.vector_store %arg8[%c0_20, %c0_21], %39 {strides = array<i32>} : memref<16x32xf32, #tpu.memory_space<vmem>>, vector<16x32xf32>,
    return
  }
  func.func @transform_0(%arg0: i32) -> (i32, i32) {
    %c0_i32 = arith.constant 0 : i32
    %c0_i32_0 = arith.constant 0 : i32
    return %arg0, %c0_i32 : i32, i32
  }
  func.func @transform_1(%arg0: i32) -> (i32, i32) {
    %c0_i32 = arith.constant 0 : i32
    %c0_i32_0 = arith.constant 0 : i32
    %c0_i32_1 = arith.constant 0 : i32
    return %c0_i32, %c0_i32_0 : i32, i32
  }
  func.func @transform_2(%arg0: i32) -> (i32, i32) {
    %c0_i32 = arith.constant 0 : i32
    %c0_i32_0 = arith.constant 0 : i32
    %c0_i32_1 = arith.constant 0 : i32
    return %c0_i32, %c0_i32_0 : i32, i32
  }
  func.func @transform_3(%arg0: i32) -> (i32, i32) {
    %c0_i32 = arith.constant 0 : i32
    %c0_i32_0 = arith.constant 0 : i32
    %c0_i32_1 = arith.constant 0 : i32
    return %c0_i32, %c0_i32_0 : i32, i32
  }
  func.func @transform_4(%arg0: i32) -> (i32, i32) {
    %c0_i32 = arith.constant 0 : i32
    %c0_i32_0 = arith.constant 0 : i32
    %c0_i32_1 = arith.constant 0 : i32
    return %c0_i32, %c0_i32_0 : i32, i32
  }
  func.func @transform_5(%arg0: i32) -> (i32, i32) {
    %c0_i32 = arith.constant 0 : i32
    %c0_i32_0 = arith.constant 0 : i32
    %c0_i32_1 = arith.constant 0 : i32
    return %c0_i32, %c0_i32_0 : i32, i32
  }
  func.func @transform_6(%arg0: i32) -> (i32, i32) {
    %c0_i32 = arith.constant 0 : i32
    %c0_i32_0 = arith.constant 0 : i32
    %c0_i32_1 = arith.constant 0 : i32
    return %c0_i32, %c0_i32_0 : i32, i32
  }
  func.func @transform_7(%arg0: i32) -> (i32, i32) {
    %c0_i32 = arith.constant 0 : i32
    %c0_i32_0 = arith.constant 0 : i32
    return %arg0, %c0_i32 : i32, i32
  }
}

module attributes {stable_mosaic.version = 11 : i64} {
  func.func @_linear_kernel(%arg0: i32, %arg1: i32, %arg2: memref<16x32xf32, #tpu.memory_space<vmem>>, %arg3: memref<64x32xbf16, #tpu.memory_space<vmem>>, %arg4: memref<1x64xf32, #tpu.memory_space<vmem>>, %arg5: memref<16x64xf32, #tpu.memory_space<vmem>>) attributes {dimension_semantics = [#tpu.dimension_semantics<parallel>, #tpu.dimension_semantics<parallel>], iteration_bounds = array<i64: 1, 1>, scalar_prefetch = 0 : i64, scratch_operands = 0 : i64, tpu.core_type = #tpu.core_type<tc>, window_params = [{transform_indices = @transform_0, window_bounds = array<i64: 16, 32>}, {transform_indices = @transform_1, window_bounds = array<i64: 64, 32>}, {transform_indices = @transform_2, window_bounds = array<i64: 1, 64>}, {transform_indices = @transform_3, window_bounds = array<i64: 16, 64>}]} {
    %c0 = arith.constant 0 : index
    %c0_0 = arith.constant 0 : index
    %0 = vector.load %arg2[%c0, %c0_0] : memref<16x32xf32, #tpu.memory_space<vmem>>, vector<16x32xf32>
    %1 = arith.truncf %0 : vector<16x32xf32> to vector<16x32xbf16>
    %c0_1 = arith.constant 0 : index
    %c0_2 = arith.constant 0 : index
    %2 = vector.load %arg3[%c0_1, %c0_2] : memref<64x32xbf16, #tpu.memory_space<vmem>>, vector<64x32xbf16>
    %cst = arith.constant dense<0.000000e+00> : vector<16x64xf32>
    %3 = tpu.matmul %1, %2, %cst {dimension_numbers = #tpu.dot_dimension_numbers<[1], [1], [0], [0], [0, 0, 1, 0], [], []>} : vector<16x32xbf16>, vector<64x32xbf16>, vector<16x64xf32> -> vector<16x64xf32>
    %c0_3 = arith.constant 0 : index
    %c0_4 = arith.constant 0 : index
    %4 = vector.load %arg4[%c0_3, %c0_4] : memref<1x64xf32, #tpu.memory_space<vmem>>, vector<1x64xf32>
    %5 = vector.broadcast %4 : vector<1x64xf32> to vector<16x64xf32>
    %6 = arith.addf %3, %5 : vector<16x64xf32>
    %c0_5 = arith.constant 0 : index
    %c0_6 = arith.constant 0 : index
    %7 = vector.load %arg5[%c0_5, %c0_6] : memref<16x64xf32, #tpu.memory_space<vmem>>, vector<16x64xf32>
    tpu.vector_store %arg5[%c0_5, %c0_6], %6 {strides = array<i32>} : memref<16x64xf32, #tpu.memory_space<vmem>>, vector<16x64xf32>,
    return
  }
  func.func @transform_0(%arg0: i32, %arg1: i32) -> (i32, i32) {
    %c0_i32 = arith.constant 0 : i32
    %c0_i32_0 = arith.constant 0 : i32
    return %arg0, %c0_i32 : i32, i32
  }
  func.func @transform_1(%arg0: i32, %arg1: i32) -> (i32, i32) {
    %c0_i32 = arith.constant 0 : i32
    %c0_i32_0 = arith.constant 0 : i32
    return %arg1, %c0_i32 : i32, i32
  }
  func.func @transform_2(%arg0: i32, %arg1: i32) -> (i32, i32) {
    %c0_i32 = arith.constant 0 : i32
    %c0_i32_0 = arith.constant 0 : i32
    return %c0_i32, %arg1 : i32, i32
  }
  func.func @transform_3(%arg0: i32, %arg1: i32) -> (i32, i32) {
    %c0_i32 = arith.constant 0 : i32
    return %arg0, %arg1 : i32, i32
  }
}

</mosaic_0001>

<bundles_post_ra>
// kernel: net_forward.9
= control target key start
LH: loop header
LB: loop body
LE: loop exit
PB: predicated region body
PF: predicated region fallthrough
CT: control target
= control target key end

     0   :  { %vm67_vm0 = vcmask 261120   ;;  %v188_v0 = vmov 0.0   ;;  %vm189_vm1 = vmmov 0   ;;  %vm138_vm2 = vcmask 781312   ;;  %s250_s1 = inlined_call_operand.vmem [shape: bf16[96,32], index: 1, kind: input, shape index: {}]   ;;  %s251_s0 = inlined_call_operand.vmem [shape: f32[16,32], index: 0, kind: input, shape index: {}]   ;;  %s252_s2 = inlined_call_operand.vmem [shape: f32[1,96], index: 2, kind: input, shape index: {}]   ;;  %s253_s3 = inlined_call_operand.vmem [shape: bf16[16,96], index: 3, kind: output, shape index: {}]  }
   0x1   :  { %164 = vmatprep.subr.bf16.mxu0 %v188_v0  ;;  %v182_v1 = vld [vmem:[%s250_s1] sm:$0xff]   ;;  %176 = vmatprep.mubr.msk.bf16.mxu0 %vm189_vm1, %v188_v0  ;;  %v183_v3 = vld [vmem:[%s250_s1 + $0x8] sm:$0xff]   ;;  %v184_v5 = vld [vmem:[%s250_s1 + $0x10] sm:$0xff]  }
   0x2   :  { %v72_v2 = vsel %vm67_vm0, %v182_v1, 0  ;;  %v75_v4 = vsel %vm67_vm0, %v183_v3, 0  ;;  %v78_v6 = vsel %vm67_vm0, %v184_v5, 0  ;;  %v185_v7 = vld [vmem:[%s250_s1 + $0x18] sm:$0xff]   ;;  %v186_v9 = vld [vmem:[%s250_s1 + $0x20] sm:$0xff]   ;;  %v187_v11 = vld [vmem:[%s250_s1 + $0x28] sm:$0xff]  }
   0x3   :  { %165 = vmatpush3.bf16.xpose.msra.mxu0 %v72_v2  ;;  %v81_v8 = vsel %vm67_vm0, %v185_v7, 0  ;;  %v84_v10 = vsel %vm67_vm0, %v186_v9, 0  ;;  %v87_v12 = vsel %vm67_vm0, %v187_v11, 0  ;;  %v15_v13 = vld [vmem:[%s251_s0] sm:$0xff]  ;;  %v16_v14 = vld [vmem:[%s251_s0 + $0x8] sm:$0xff] }
   0x4   :  { %166 = vmatprep.subr.bf16.mxu0 %v188_v0  ;;  %v17_v15 = vpack.c.bf16 %v16_v14, %v15_v13  ;;  %v145_v16 = vld [vmem:[%s252_s2] ss:$0 sm:$0xff] }
   0xb   :  { %167 = vmatpush3.bf16.xpose.msra.mxu0 %v75_v4 }
   0xc   :  { %168 = vmatprep.subr.bf16.mxu0 %v188_v0 }
  0x13   :  { %169 = vmatpush3.bf16.xpose.msra.mxu0 %v78_v6 }
  0x14   :  { %170 = vmatprep.subr.bf16.mxu0 %v188_v0 }
  0x1b   :  { %171 = vmatpush3.bf16.xpose.msra.mxu0 %v81_v8 }
  0x1c   :  { %172 = vmatprep.subr.bf16.mxu0 %v188_v0 }
  0x23   :  { %173 = vmatpush3.bf16.xpose.msra.mxu0 %v84_v10 }
  0x24   :  { %174 = vmatprep.subr.bf16.mxu0 %v188_v0 }
  0x2b   :  { %175 = vmatpush3.bf16.xpose.msra.mxu0 %v87_v12 }
  0x32   :  { %177 = vmatmul.mubr.msk.bf16.vlgmr.msra.gmra.mrb[0].mxu0 %vm67_vm0, %v17_v15 }
 0x105   :  { %v123_v17 = vpop.f32.mrb[0].mxu0 }
 0x106   :  { %v124_v18 = vadd.f32 %v145_v16, %v123_v17  ;;  %v178_v19 = vpop.f32.mrb[1].mxu0 }
 0x107   :  { %v126_v20 = vpop.f32.mrb[2].mxu0 }
 0x108   :  { %v155_v21 = vpack.c.bf16 %v124_v18, %v124_v18  ;;  %v127_v22 = vadd.f32 %v145_v16, %v126_v20  ;;  %v179_v23 = vpop.f32.mrb[3].mxu0 }
 0x10a   :  { %139 = vst.msk [vmem:[%s253_s3] sm:$0xf] %vm138_vm2, %v155_v21  ;;  %v156_v24 = vpack.c.bf16 %v127_v22, %v127_v22 }
 0x10c   :  { %140 = vst.msk [vmem:[%s253_s3 + $0x4] sm:$0xf] %vm138_vm2, %v156_v24 }

// kernel: net_forward.10
= control target key start
LH: loop header
LB: loop body
LE: loop exit
PB: predicated region body
PF: predicated region fallthrough
CT: control target
= control target key end

     0   :  { %s787_s12 = smov 0   ;;  %s789_s13 = smov 0   ;;  %s861_s0 = inlined_call_operand.vmem [shape: bf16[2,4,8,8], index: 0, kind: input, shape index: {}]   ;;  %s862_s1 = inlined_call_operand.vmem [shape: bf16[2,4,8,8], index: 1, kind: input, shape index: {}]   ;;  %s863_s2 = inlined_call_operand.vmem [shape: bf16[2,4,8,8], index: 2, kind: input, shape index: {}]   ;;  %s864_s3 = inlined_call_operand.vmem [shape: bf16[2,4,8,8], index: 3, kind: output, shape index: {}]  }
   0x1   :  { %s791_s14 = smov 0   ;;  %s793_s15 = smov 0  }
   0x2   :  { %s795_s16 = smov 0  }
   0x3 LB: > { %s35_s17 = sadd.s32 1, %s753_s14  ;;  %s39_s18 = sadd.s32 1, %s757_s15  ;;  %s761_s16 = sphi %s795_s16, %s13_s16   ;;  %s757_s15 = sphi %s793_s15, %s868_s15   ;;  %s753_s14 = sphi %s791_s14, %s867_s14   ;;  %s749_s13 = sphi %s789_s13, %s866_s13   ;;  %s745_s12 = sphi %s787_s12, %s865_s12  }
   0x4   : > { %p37_p0 = scmp.ge.s32.totalorder %s35_s17, 4  ;;  %p642_p1 = scmp.ge.s32.totalorder %s761_s16, 1 }
   0x5   : > { %p217_p2 = scmp.lt.s32.totalorder %s761_s16, 9 }
   0x6   : > { %s870_s17 = smov (%p37_p0, %s35_s17), 0  ;;  %s872_s18 = smov (!%p37_p0, %s39_s18), %s757_s15 }
   0x7   : > { %p218_p3 = pnand %p642_p1, %p217_p2  ;;  %p41_p4 = scmp.ge.s32.totalorder %s872_s18, 2 }
   0x8   : > { %p275_p5 = scmp.lt.s32.totalorder (!%p218_p3), %s749_s13, 1  ;;  %p277_p6 = scmp.lt.s32.totalorder (!%p218_p3), %s745_s12, 3  ;;  %vm327_vm0 = vcmask (!%p218_p3), 64512   ;;  %v763_v0 = vmov (!%p218_p3), 0.0   ;;  %vm764_vm1 = vmmov (!%p218_p3), 0   ;;  %vm324_vm2 = vcmask (!%p218_p3), 7168  }
   0x9   : > { %s874_s18 = smov (%p41_p4, %s872_s18), 0  ;;  %221 = sbr.rel (%p218_p3) target bundleno = 828 (0x33c), region = 32 }
   0xa   : > { %659 = vmatprep.subr.bf16.mxu0 (!%p218_p3), %v763_v0  ;;  %328 = vst.msk [vmem:[#allocation4] sm:$0xff] (!%p218_p3), %vm327_vm0, %v763_v0  ;;  %661 = vmatprep.mubr.msk.bf16.mxu0 (!%p218_p3), %vm764_vm1, %v763_v0  ;;  %v765_v7 = vmov (!%p218_p3), -1e+30   ;;  %v382_v8 = vlaneseq (!%p218_p3)  ;;  %v766_v17 = vmov (!%p218_p3), 0   ;;  %vm429_vm4 = vcmask (!%p218_p3), 1043456  }
   0xb   : > { %665 = vmatprep.subr.bf16.mxu1 (!%p218_p3), %v763_v0  ;;  %667 = vmatprep.mubr.msk.bf16.mxu1 (!%p218_p3), %vm764_vm1, %v763_v0  ;;  %325 = vst.msk [vmem:[#allocation2] sm:$0xff] (!%p218_p3), %vm324_vm2, %v765_v7  ;;  %326 = vst.msk [vmem:[#allocation3] sm:$0xff] (!%p218_p3), %vm324_vm2, %v763_v0  ;;  %vm489_vm5 = vcmask (!%p218_p3), 60416  }
   0xc   : > { %v383_v9 = vshrl.u32 (!%p218_p3), %v382_v8, 7  ;;  %v388_v10 = vand.u32 (!%p218_p3), 127, %v382_v8  ;;  %715 = vset.pattern.permute.xlu0 (!%p218_p3), %v766_v17  ;;  %716 = vset.pattern.permute.xlu1 (!%p218_p3), %v766_v17 }
   0xe   : > { %vm391_vm3 = vcmp.le.s32.totalorder (!%p218_p3), %v388_v10, %v383_v9 }
  0x10   : > { %s876_s13 = smov (!%p275_p5, %s749_s13), 1  ;;  %s878_s12 = smov (!%p277_p6, %s745_s12), 3 }
  0x11   : > { %s643_s19 = sshll.u32 %s876_s13, 2  ;;  %v417_v38 = vld [vmem:[#allocation4] sm:$0xff] }
  0x12   : > { %s283_s20 = sadd.s32 %s643_s19, %s878_s12  ;;  %v393_v18 = vld [vmem:[#allocation2] sm:$0xff]  ;;  %v409_v32 = vld [vmem:[#allocation3] sm:$0xff] }
  0x13   : > { %s818_s21 = sshll.u32 %s283_s20, 2 }
  0x14   : > { %s296_s24 = scalar_lea.vmem %s862_s1, %s818_s21  ;;  %s285_s27 = scalar_lea.vmem %s861_s0, %s818_s21 }
  0x15   : > { %v333_v1 = vld [vmem:[%s296_s24] sm:$0xf]  ;;  %s307_s30 = scalar_lea.vmem %s863_s2, %s818_s21  ;;  %s318_s6 = scalar_lea.vmem %s864_s3, %s818_s21 }
  0x16   : > { %v329_v2 = vld [vmem:[%s285_s27] sm:$0xf]  ;;  %v339_v3 = vsel %vm327_vm0, %v333_v1, 0 }
  0x17   : > { %v330_v4 = vunpack.c.l.bf16 %v329_v2  ;;  %660 = vmatpush3.bf16.xpose.msra.mxu0 %v339_v3  ;;  %v425_v22 = vld [vmem:[%s307_s30] sm:$0xf] }
  0x18   : > { %v431_v23 = vsel %vm429_vm4, %v425_v22, 0 }
  0x19   : > { %v331_v5 = vmul.f32 0.35355338, %v330_v4  ;;  %666 = vmatpush3.bf16.msra.mxu1 %v431_v23 }
  0x1b   : > { %v332_v6 = vpack.c.bf16 %v331_v5, %v331_v5 }
  0x1e   : > { %662 = vmatmul.mubr.msk.bf16.vlgmr.msra.gmra.mrb[0].mxu0 %vm327_vm0, %v332_v6 }
  0xf1   : > { %v375_v11 = vpop.f32.mrb[0].mxu0 }
  0xf2   : > { %v392_v12 = vsel %vm391_vm3, %v375_v11, -1e+30  ;;  %v663_v13 = vpop.f32.mrb[1].mxu0 }
  0xf3   : > { %v378_v14 = vpop.f32.mrb[2].mxu0  ;;  %v394_v15 = vsel %vm327_vm0, %v392_v12, -inf }
  0xf4   : > { %395 = vmax.xlane.f32.xlu0 %v394_v15  ;;  %v664_v16 = vpop.f32.mrb[3].mxu0 }
 0x181   : > { %v396_v19 = vpop.xlane.xlu0 %395 }
 0x182   : > { %v397_v20 = vmax.f32 %v393_v18, %v396_v19 }
 0x184   : > { %v398_v21 = vsub.f32 %v393_v18, %v397_v20  ;;  %475 = vst.msk [vmem:[#allocation2] sm:$0xff] %vm324_vm2, %v397_v20  ;;  %403 = vperm.xlu0 %715, %v397_v20  }
 0x186   : > { %v399_v30 = vmul.f32 1.442695, %v398_v21 }
 0x203   : > { %v404_v24 = vpop.permute.xlu0 %403 }
 0x204   : > { %v406_v25 = vsub.f32 %v392_v12, %v404_v24 }
 0x206   : > { %v407_v26 = vmul.f32 1.442695, %v406_v25 }
 0x208   : > { %717 = vpow2.f32 %v407_v26 }
 0x209   : > { %719 = vpow2.f32 %v399_v30 }
 0x212   : > { %v718_v27 = vpop.eup %717 }
 0x213   : > { %v411_v28 = vsel %vm327_vm0, %v718_v27, 0.0  ;;  %v424_v29 = vpack.c.bf16 %v718_v27, %v718_v27  ;;  %v720_v31 = vpop.eup %719 }
 0x214   : > { %412 = vadd.xlane.f32.xlu1 %v411_v28  ;;  %v410_v33 = vmul.f32 %v720_v31, %v409_v32 }
 0x215   : > { %668 = vmatmul.mubr.msk.bf16.vlgmr.msra.gmra.mrb[0].mxu1 %vm327_vm0, %v424_v29 }
 0x225   : > { %420 = vperm.xlu1 %716, %v720_v31  }
 0x2a1   : > { %v413_v34 = vpop.xlane.xlu1 %412 }
 0x2a2   : > { %v414_v35 = vadd.f32 %v413_v34, %v410_v33 }
 0x2a4   : > { %416 = vst.msk [vmem:[#allocation3] sm:$0xff] %vm324_vm2, %v414_v35 }
 0x2a5   : > { %v421_v39 = vpop.permute.xlu1 %420 }
 0x2a6   : > { %v423_v40 = vmul.f32 %v421_v39, %v417_v38 }
 0x2ab   : > { %v480_v36 = vld [vmem:[#allocation3] sm:$0xff] }
 0x2ac   : > { %721 = vrcp.f32 %v480_v36 }
 0x2b6   : > { %v722_v37 = vpop.eup %721 }
 0x2b7   : > { %484 = vperm.xlu1 %716, %v722_v37  }
 0x2e8   : > { %v467_v41 = vpop.f32.mrb[0].mxu1 }
 0x2e9   : > { %v473_v42 = vadd.f32 %v467_v41, %v423_v40  ;;  %v669_v43 = vpop.f32.mrb[1].mxu1 }
 0x2ea   : > { %v470_v44 = vpop.f32.mrb[2].mxu1 }
 0x2eb   : > { %474 = vst.msk [vmem:[#allocation4] sm:$0xff] %vm327_vm0, %v473_v42  ;;  %v670_v45 = vpop.f32.mrb[3].mxu1 }
 0x2f2   : > { %v479_v46 = vld [vmem:[#allocation4] sm:$0xff] }
 0x336   : > { %v485_v47 = vpop.permute.xlu1 %484 }
 0x337   : > { %v487_v48 = vmul.f32 %v485_v47, %v479_v46 }
 0x339   : > { %v488_v49 = vpack.c.bf16 %v487_v48, %v487_v48 }
 0x33b   : > { %490 = vst.msk [vmem:[%s318_s6] sm:$0xf] %vm489_vm5, %v488_v49 }
 0x33c PF: > { %s13_s16 = sadd.s32 1, %s761_s16   ;;  %s865_s12 = smov %s753_s14 }
 0x33d   : > { %p10_p7 = scmp.ge.s32.totalorder %s13_s16, 10   ;;  %s866_s13 = smov %s757_s15 }
 0x33e   : > { %s867_s14 = smov %s870_s17  ;;  %s868_s15 = smov %s874_s18 }
 0x33f   :  { %12 = sbr.rel (!%p10_p7) target bundleno = 3 (0x3), region = 76 }

// kernel: net_forward.11
= control target key start
LH: loop header
LB: loop body
LE: loop exit
PB: predicated region body
PF: predicated region fallthrough
CT: control target
= control target key end

     0   :  { %vm45_vm0 = vcmask 261120   ;;  %v187_v0 = vmov 0.0   ;;  %vm188_vm1 = vmmov 0   ;;  %s263_s2 = inlined_call_operand.vmem [shape: bf16[32,32], index: 2, kind: input, shape index: {}]   ;;  %s264_s0 = inlined_call_operand.vmem [shape: bf16[16,32], index: 0, kind: input, shape index: {}]   ;;  %s265_s1 = inlined_call_operand.vmem [shape: f32[16,32], index: 1, kind: input, shape index: {}]   ;;  %s266_s3 = inlined_call_operand.vmem [shape: f32[1,32], index: 3, kind: input, shape index: {}]   ;;  %s267_s4 = inlined_call_operand.vmem [shape: f32[1,32], index: 4, kind: input, shape index: {}]   ;;  %s268_s5 = inlined_call_operand.vmem [shape: f32[1,32], index: 5, kind: input, shape index: {}]   ;;  %s269_s6 = inlined_call_operand.vmem [shape: f32[16,32], index: 6, kind: output, shape index: {}]  }
   0x1   :  { %170 = vmatprep.subr.bf16.mxu0 %v187_v0  ;;  %v180_v1 = vld [vmem:[%s263_s2] sm:$0xff]   ;;  %174 = vmatprep.mubr.msk.bf16.mxu0 %vm188_vm1, %v187_v0  ;;  %v181_v3 = vld [vmem:[%s263_s2 + $0x8] sm:$0xff]  }
   0x2   :  { %v50_v2 = vsel %vm45_vm0, %v180_v1, 0  ;;  %v53_v4 = vsel %vm45_vm0, %v181_v3, 0  ;;  %v182_v5 = vld [vmem:[%s264_s0] sm:$0xff]   ;;  %v97_v8 = vld [vmem:[%s265_s1 + $0x8] sm:$0xff] }
   0x3   :  { %171 = vmatpush3.bf16.xpose.msra.mxu0 %v50_v2  ;;  %v96_v6 = vld [vmem:[%s265_s1] sm:$0xff] }
   0x4   :  { %172 = vmatprep.subr.bf16.mxu0 %v187_v0  ;;  %v164_v9 = vld [vmem:[%s266_s3] ss:$0 sm:$0xff] }
   0x5   :  { %v165_v36 = vld [vmem:[%s267_s4] ss:$0 sm:$0xff] }
   0x6   :  { %v166_v38 = vld [vmem:[%s268_s5] ss:$0 sm:$0xff] }
   0xb   :  { %173 = vmatpush3.bf16.xpose.msra.mxu0 %v53_v4 }
  0x12   :  { %175 = vmatmul.mubr.msk.bf16.vlgmr.msra.gmra.mrb[0].mxu0 %vm45_vm0, %v182_v5 }
  0xe5   :  { %v89_v7 = vpop.f32.mrb[0].mxu0 }
  0xe6   :  { %v98_v10 = vadd.f32 %v96_v6, %v89_v7  ;;  %v176_v11 = vpop.f32.mrb[1].mxu0 }
  0xe7   :  { %v92_v12 = vpop.f32.mrb[2].mxu0 }
  0xe8   :  { %v99_v13 = vadd.f32 %v97_v8, %v92_v12  ;;  %v177_v14 = vpop.f32.mrb[3].mxu0  ;;  %v107_v15 = vadd.f32 %v164_v9, %v98_v10 }
  0xea   :  { %v111_v16 = vsel %vm45_vm0, %v107_v15, 0.0  ;;  %v108_v17 = vadd.f32 %v164_v9, %v99_v13 }
  0xeb   :  { %112 = vadd.xlane.f32.xlu0 %v111_v16 }
  0xec   :  { %v114_v18 = vsel %vm45_vm0, %v108_v17, 0.0 }
  0xef   :  { %115 = vadd.xlane.f32.xlu0 %v114_v18 }
 0x178   :  { %v113_v19 = vpop.xlane.xlu0 %112 }
 0x179   :  { %v118_v20 = vmul.f32 0.03125, %v113_v19 }
 0x17b   :  { %v120_v21 = vsub.f32 %v107_v15, %v118_v20 }
 0x17c   :  { %v116_v22 = vpop.xlane.xlu0 %115 }
 0x17d   :  { %v119_v23 = vmul.f32 0.03125, %v116_v22  ;;  %v122_v24 = vmul.f32 %v120_v21, %v120_v21 }
 0x17f   :  { %v121_v25 = vsub.f32 %v108_v17, %v119_v23  ;;  %v124_v26 = vsel %vm45_vm0, %v122_v24, 0.0 }
 0x180   :  { %125 = vadd.xlane.f32.xlu1 %v124_v26 }
 0x181   :  { %v123_v27 = vmul.f32 %v121_v25, %v121_v25 }
 0x183   :  { %v127_v28 = vsel %vm45_vm0, %v123_v27, 0.0 }
 0x184   :  { %128 = vadd.xlane.f32.xlu1 %v127_v28 }
 0x20d   :  { %v126_v29 = vpop.xlane.xlu1 %125 }
 0x20e   :  { %v130_v30 = vmul.f32 0.03125, %v126_v29 }
 0x210   :  { %v132_v31 = vadd.f32 1e-05, %v130_v30 }
 0x211   :  { %v129_v32 = vpop.xlane.xlu1 %128 }
 0x212   :  { %183 = vrsqrt.f32 %v132_v31  ;;  %v131_v33 = vmul.f32 0.03125, %v129_v32 }
 0x214   :  { %v133_v34 = vadd.f32 1e-05, %v131_v33 }
 0x216   :  { %185 = vrsqrt.f32 %v133_v34 }
 0x21c   :  { %v184_v35 = vpop.eup %183 }
 0x21d   :  { %v136_v37 = vmul.f32 %v184_v35, %v120_v21 }
 0x21f   :  { %v144_v39 = vmul.f32 %v165_v36, %v136_v37 }
 0x220   :  { %v186_v40 = vpop.eup %185 }
 0x221   :  { %v152_v41 = vadd.f32 %v166_v38, %v144_v39  ;;  %v137_v42 = vmul.f32 %v186_v40, %v121_v25 }
 0x223   :  { %154 = vst.msk [vmem:[%s269_s6] sm:$0xff] %vm45_vm0, %v152_v41  ;;  %v145_v43 = vmul.f32 %v165_v36, %v137_v42 }
 0x225   :  { %v153_v44 = vadd.f32 %v166_v38, %v145_v43 }
 0x227   :  { %155 = vst.msk [vmem:[%s269_s6 + $0x8] sm:$0xff] %vm45_vm0, %v153_v44 }

// kernel: net_forward.12
= control target key start
LH: loop header
LB: loop body
LE: loop exit
PB: predicated region body
PF: predicated region fallthrough
CT: control target
= control target key end

     0   :  { %vm65_vm0 = vcmask 261120   ;;  %v302_v0 = vmov 0.0   ;;  %vm303_vm1 = vmmov 0   ;;  %vm146_vm2 = vcmask 523264   ;;  %s400_s1 = inlined_call_operand.vmem [shape: bf16[64,32], index: 1, kind: input, shape index: {}]   ;;  %s401_s3 = inlined_call_operand.vmem [shape: bf16[32,64], index: 3, kind: input, shape index: {}]   ;;  %s402_s0 = inlined_call_operand.vmem [shape: f32[16,32], index: 0, kind: input, shape index: {}]   ;;  %s403_s2 = inlined_call_operand.vmem [shape: f32[1,64], index: 2, kind: input, shape index: {}]   ;;  %s404_s4 = inlined_call_operand.vmem [shape: f32[1,32], index: 4, kind: input, shape index: {}]   ;;  %s405_s5 = inlined_call_operand.vmem [shape: f32[1,32], index: 5, kind: input, shape index: {}]   ;;  %s406_s6 = inlined_call_operand.vmem [shape: f32[1,32], index: 6, kind: input, shape index: {}]   ;;  %s407_s7 = inlined_call_operand.vmem [shape: f32[16,32], index: 7, kind: output, shape index: {}]  }
   0x1   :  { %270 = vmatprep.subr.bf16.mxu0 %v302_v0  ;;  %v292_v1 = vld [vmem:[%s400_s1] sm:$0xff]   ;;  %278 = vmatprep.mubr.msk.bf16.mxu0 %vm303_vm1, %v302_v0  ;;  %v293_v3 = vld [vmem:[%s400_s1 + $0x8] sm:$0xff]   ;;  %v294_v7 = vld [vmem:[%s400_s1 + $0x10] sm:$0xff]  }
   0x2   :  { %282 = vmatprep.subr.bf16.mxu1 %v302_v0  ;;  %286 = vmatprep.mubr.msk.bf16.mxu1 %vm303_vm1, %v302_v0  ;;  %v70_v2 = vsel %vm65_vm0, %v292_v1, 0  ;;  %v296_v4 = vld [vmem:[%s401_s3] sm:$0xff]   ;;  %v73_v6 = vsel %vm65_vm0, %v293_v3, 0  ;;  %v76_v8 = vsel %vm65_vm0, %v294_v7, 0  ;;  %v295_v9 = vld [vmem:[%s400_s1 + $0x18] sm:$0xff]   ;;  %v28_v12 = vld [vmem:[%s402_s0 + $0x8] sm:$0xff] }
   0x3   :  { %271 = vmatpush3.bf16.xpose.msra.mxu0 %v70_v2  ;;  %v151_v5 = vsel %vm146_vm2, %v296_v4, 0  ;;  %v79_v10 = vsel %vm65_vm0, %v295_v9, 0  ;;  %v27_v11 = vld [vmem:[%s402_s0] sm:$0xff]  ;;  %v297_v14 = vld [vmem:[%s401_s3 + $0x8] sm:$0xff]  }
   0x4   :  { %272 = vmatprep.subr.bf16.mxu0 %v302_v0  ;;  %283 = vmatpush3.bf16.xpose.msra.mxu1 %v151_v5  ;;  %v29_v13 = vpack.c.bf16 %v28_v12, %v27_v11  ;;  %v154_v15 = vsel %vm146_vm2, %v297_v14, 0  ;;  %v250_v16 = vld [vmem:[%s403_s2] ss:$0 sm:$0xff] }
   0x5   :  { %284 = vmatprep.subr.bf16.mxu1 %v302_v0  ;;  %v256_v26 = vld [vmem:[%s404_s4] ss:$0 sm:$0xff] }
   0x6   :  { %v260_v54 = vld [vmem:[%s405_s5] ss:$0 sm:$0xff] }
   0x7   :  { %v261_v56 = vld [vmem:[%s406_s6] ss:$0 sm:$0xff] }
   0xb   :  { %273 = vmatpush3.bf16.xpose.msra.mxu0 %v73_v6 }
   0xc   :  { %274 = vmatprep.subr.bf16.mxu0 %v302_v0  ;;  %285 = vmatpush3.bf16.xpose.msra.mxu1 %v154_v15 }
  0x13   :  { %275 = vmatpush3.bf16.xpose.msra.mxu0 %v76_v8 }
  0x14   :  { %276 = vmatprep.subr.bf16.mxu0 %v302_v0 }
  0x1b   :  { %277 = vmatpush3.bf16.xpose.msra.mxu0 %v79_v10 }
  0x22   :  { %279 = vmatmul.mubr.msk.bf16.vlgmr.msra.gmra.mrb[0].mxu0 %vm65_vm0, %v29_v13 }
  0xf5   :  { %v115_v17 = vpop.f32.mrb[0].mxu0 }
  0xf6   :  { %v116_v18 = vadd.f32 %v250_v16, %v115_v17  ;;  %v280_v19 = vpop.f32.mrb[1].mxu0 }
  0xf7   :  { %v118_v20 = vpop.f32.mrb[2].mxu0 }
  0xf8   :  { %v119_v21 = vadd.f32 %v250_v16, %v118_v20  ;;  %v281_v22 = vpop.f32.mrb[3].mxu0  ;;  %v122_v23 = vmax.f32 %v116_v18, 0.0 }
  0xfa   :  { %v123_v24 = vmax.f32 %v119_v21, 0.0 }
  0xfc   :  { %v124_v25 = vpack.c.bf16 %v123_v24, %v122_v23 }
  0xfe   :  { %287 = vmatmul.mubr.msk.bf16.vlgmr.msra.gmra.mrb[0].mxu1 %vm146_vm2, %v124_v25 }
 0x1d1   :  { %v190_v27 = vpop.f32.mrb[0].mxu1 }
 0x1d2   :  { %v191_v28 = vadd.f32 %v256_v26, %v190_v27  ;;  %v288_v29 = vpop.f32.mrb[1].mxu1 }
 0x1d3   :  { %v193_v30 = vpop.f32.mrb[2].mxu1 }
 0x1d4   :  { %v194_v31 = vadd.f32 %v256_v26, %v193_v30  ;;  %v289_v32 = vpop.f32.mrb[3].mxu1  ;;  %v197_v33 = vadd.f32 %v191_v28, %v27_v11 }
 0x1d6   :  { %v201_v34 = vsel %vm65_vm0, %v197_v33, 0.0  ;;  %v198_v35 = vadd.f32 %v194_v31, %v28_v12 }
 0x1d7   :  { %202 = vadd.xlane.f32.xlu0 %v201_v34 }
 0x1d8   :  { %v204_v36 = vsel %vm65_vm0, %v198_v35, 0.0 }
 0x1db   :  { %205 = vadd.xlane.f32.xlu0 %v204_v36 }
 0x264   :  { %v203_v37 = vpop.xlane.xlu0 %202 }
 0x265   :  { %v208_v38 = vmul.f32 0.03125, %v203_v37 }
 0x267   :  { %v210_v39 = vsub.f32 %v197_v33, %v208_v38 }
 0x268   :  { %v206_v40 = vpop.xlane.xlu0 %205 }
 0x269   :  { %v209_v41 = vmul.f32 0.03125, %v206_v40  ;;  %v212_v42 = vmul.f32 %v210_v39, %v210_v39 }
 0x26b   :  { %v211_v43 = vsub.f32 %v198_v35, %v209_v41  ;;  %v214_v44 = vsel %vm65_vm0, %v212_v42, 0.0 }
 0x26c   :  { %215 = vadd.xlane.f32.xlu1 %v214_v44 }
 0x26d   :  { %v213_v45 = vmul.f32 %v211_v43, %v211_v43 }
 0x26f   :  { %v217_v46 = vsel %vm65_vm0, %v213_v45, 0.0 }
 0x270   :  { %218 = vadd.xlane.f32.xlu1 %v217_v46 }
 0x2f9   :  { %v216_v47 = vpop.xlane.xlu1 %215 }
 0x2fa   :  { %v220_v48 = vmul.f32 0.03125, %v216_v47 }
 0x2fc   :  { %v222_v49 = vadd.f32 1e-05, %v220_v48 }
 0x2fd   :  { %v219_v50 = vpop.xlane.xlu1 %218 }
 0x2fe   :  { %298 = vrsqrt.f32 %v222_v49  ;;  %v221_v51 = vmul.f32 0.03125, %v219_v50 }
 0x300   :  { %v223_v52 = vadd.f32 1e-05, %v221_v51 }
 0x302   :  { %300 = vrsqrt.f32 %v223_v52 }
 0x308   :  { %v299_v53 = vpop.eup %298 }
 0x309   :  { %v226_v55 = vmul.f32 %v299_v53, %v210_v39 }
 0x30b   :  { %v234_v57 = vmul.f32 %v260_v54, %v226_v55 }
 0x30c   :  { %v301_v58 = vpop.eup %300 }
 0x30d   :  { %v242_v59 = vadd.f32 %v261_v56, %v234_v57  ;;  %v227_v60 = vmul.f32 %v301_v58, %v211_v43 }
 0x30f   :  { %244 = vst.msk [vmem:[%s407_s7] sm:$0xff] %vm65_vm0, %v242_v59  ;;  %v235_v61 = vmul.f32 %v260_v54, %v227_v60 }
 0x311   :  { %v243_v62 = vadd.f32 %v261_v56, %v235_v61 }
 0x313   :  { %245 = vst.msk [vmem:[%s407_s7 + $0x8] sm:$0xff] %vm65_vm0, %v243_v62 }

// kernel: net_forward.17
= control target key start
LH: loop header
LB: loop body
LE: loop exit
PB: predicated region body
PF: predicated region fallthrough
CT: control target
= control target key end

     0   :  { %v186_v1 = vmov 0.0   ;;  %vm54_vm0 = vcmask 261120   ;;  %vm187_vm1 = vmmov 0   ;;  %s249_s0 = inlined_call_operand.vmem [shape: f32[16,32], index: 0, kind: input, shape index: {}]   ;;  %s250_s1 = inlined_call_operand.vmem [shape: bf16[64,32], index: 1, kind: input, shape index: {}]   ;;  %s251_s2 = inlined_call_operand.vmem [shape: f32[1,64], index: 2, kind: input, shape index: {}]   ;;  %s252_s3 = inlined_call_operand.hbm [shape: f32[16,64], index: 3, kind: output, shape index: {}]  }
   0x1   :  { %v158_v0 = vld [vmem:[%s250_s1] sm:$0xff]   ;;  %141 = vmatprep.subr.bf16.mxu0 %v186_v1  ;;  %v159_v3 = vld [vmem:[%s250_s1 + $0x8] sm:$0xff]   ;;  %149 = vmatprep.mubr.msk.bf16.mxu0 %vm187_vm1, %v186_v1 }
   0x2   :  { %v59_v2 = vsel %vm54_vm0, %v158_v0, 0 }
   0x3   :  { %142 = vmatpush3.bf16.xpose.msra.mxu0 %v59_v2 }
   0x4   :  { %143 = vmatprep.subr.bf16.mxu0 %v186_v1 }
   0x5   :  { %8 = vsyncpa [#allocation3], 0  ;;  %v62_v4 = vsel %vm54_vm0, %v159_v3, 0  ;;  %v160_v5 = vld [vmem:[%s250_s1 + $0x10] sm:$0xff]   ;;  %v161_v7 = vld [vmem:[%s250_s1 + $0x18] sm:$0xff]   ;;  %s188_s26 = smov [#allocation2]  }
   0x6   :  { %v65_v6 = vsel %vm54_vm0, %v160_v5, 0  ;;  %v68_v8 = vsel %vm54_vm0, %v161_v7, 0  ;;  %v16_v9 = vld [vmem:[%s249_s0] sm:$0xff]  ;;  %v17_v10 = vld [vmem:[%s249_s0 + $0x8] sm:$0xff]  ;;  %s119_s1 = sshll.u32 %s188_s26, 4  ;;  %vm111_vm2 = vcmask 523264   ;;  %s120_s1 = int_to_ptr.vmem [resolvable:$true] %s119_s1 }
   0x7   :  { %v18_v11 = vpack.c.bf16 %v17_v10, %v16_v9  ;;  %v130_v12 = vld [vmem:[%s251_s2] ss:$0 sm:$0xff]  ;;  %s162_s0 = scalar_lea.vmem %s120_s1, 256  ;;  %p167_p1 = scmp.lt.s32.totalorder %s120_s1, %s120_s1 }
   0x8   :  { %p163_p0 = scmp.ne.s32.totalorder %s120_s1, %s162_s0  ;;  %p168_p2 = scmp.lt.s32.totalorder %s162_s0, %s162_s0 }
   0xa   :  { %p169_p3 = por %p168_p2, %p167_p1 }
   0xb   :  { %144 = vmatpush3.bf16.xpose.msra.mxu0 %v62_v4 }
   0xc   :  { %145 = vmatprep.subr.bf16.mxu0 %v186_v1  ;;  %p170_p4 = pnand %p169_p3, %p163_p0 }
  0x13   :  { %146 = vmatpush3.bf16.xpose.msra.mxu0 %v65_v6 }
  0x14   :  { %147 = vmatprep.subr.bf16.mxu0 %v186_v1 }
  0x1b   :  { %148 = vmatpush3.bf16.xpose.msra.mxu0 %v68_v8 }
  0x22   :  { %150 = vmatmul.mubr.msk.bf16.vlgmr.msra.gmra.mrb[0].mxu0 %vm54_vm0, %v18_v11 }
  0xf5   :  { %v104_v13 = vpop.f32.mrb[0].mxu0 }
  0xf6   :  { %v105_v14 = vadd.f32 %v130_v12, %v104_v13  ;;  %v151_v15 = vpop.f32.mrb[1].mxu0 }
  0xf7   :  { %v107_v16 = vpop.f32.mrb[2].mxu0 }
  0xf8   :  { %112 = vst.msk [vmem:[#allocation2] sm:$0xff] %vm111_vm2, %v105_v14  ;;  %v108_v17 = vadd.f32 %v130_v12, %v107_v16  ;;  %v152_v18 = vpop.f32.mrb[3].mxu0 }
  0xfa   :  { %113 = vst.msk [vmem:[#allocation2 + $0x8] sm:$0xff] %vm111_vm2, %v108_v17 }
  0xfb   :  { %173 = shalt.err (!%p170_p4)
}
  0xfc   :  { %s174_s28 = scalar_lea.hbm %s252_s3, 256 }
  0xfd   :  { %p175_p5 = scmp.ne.s32.totalorder %s252_s3, %s174_s28  ;;  %p178_p6 = scmp.lt.u32.totalorder %s174_s28, %s252_s3 }
  0xff   :  { %p180_p7 = pnand %p178_p6, %p175_p5 }
 0x101   :  { %183 = shalt.err (!%p180_p7)
}
 0x102   :  { %s189_s6 = smov 128   ;;  %s190_s7 = smov 8  }
 0x103   :  { %125 = dma.vmem_to_hbm [thread:$0]  %s120_s1, 256, %s252_s3, [#allocation3], %s189_s6, %s189_s6, %s190_s7  }
 0x104   :  { %184 = dma.done.wait [#allocation3], 256  }
 0x105   :  { %185 = vsyncadd [#allocation3], 4294967040 }
 0x106   :  { %129 = vsyncpa [#allocation3], 1 }

</bundles_post_ra>
